<compile_context>
chip_gen: v6e
topology: v6e:2x2x1
jax: 0.10.0
libtpu: 0.0.40
codegen_flags: <defaults>
</compile_context>

<pallas_src>
import functools

import jax
import jax.numpy as jnp
from jax import lax
from jax.experimental import pallas as pl
from jax.experimental.pallas import tpu as pltpu


def _round_up(x, m):
    return max(m, ((x + m - 1) // m) * m)


def rnn_fused_kernel(x_ref, wih_ref, whh_ref, b_ref, wfc_ref, bfc_ref,
                     out_ref, xp_ref, *, seq_len, b_pad, unroll):
    """Single-invocation fused RNN + FC head.

    x_ref   : (S * B_pad, E)       embedded tokens, time-major, batch padded to 8
    wih_ref : (E, H_pad)           W_ih^T, hidden zero-padded to 128 lanes
    whh_ref : (H_pad, H_pad)       W_hh^T, zero-padded rows+cols
    b_ref   : (1, H_pad)           b_ih + b_hh, zero-padded
    wfc_ref : (H_pad, O_pad)       W_fc^T, zero-padded rows+cols
    bfc_ref : (1, O_pad)           b_fc zero-padded to 128 lanes
    out_ref : (B_pad, O_pad)       fc(h_T), lane-dense output tile
    xp_ref  : (S * B_pad, H_pad)   VMEM scratch: hoisted input projection
    """
    # Input projection X @ W_ih^T + (b_ih + b_hh), hoisted out of the serial
    # recurrence.  Split so that step 0 only depends on its own chunk; the
    # bulk of the projection can be scheduled into MXU idle cycles of the
    # latency-bound recurrence.
    xp_ref[pl.ds(0, b_pad), :] = (
        jnp.dot(x_ref[pl.ds(0, b_pad), :], wih_ref[...],
                preferred_element_type=jnp.float32)
        + b_ref[...]
    )
    if seq_len > 1:
        rest = (seq_len - 1) * b_pad
        xp_ref[pl.ds(b_pad, rest), :] = (
            jnp.dot(x_ref[pl.ds(b_pad, rest), :], wih_ref[...],
                    preferred_element_type=jnp.float32)
            + b_ref[...]
        )

    h_pad = whh_ref.shape[0]

    def step(t, h):
        start = pl.multiple_of(t * b_pad, b_pad)          # b_pad is a mult. of 8
        xp_t = xp_ref[pl.ds(start, b_pad), :]             # (B_pad, H_pad)
        # W_hh stays a ref read inside the loop (loop-invariant RHS, no large
        # value live range across unrolled iterations).
        return jnp.tanh(
            xp_t + jnp.dot(h, whh_ref[...], preferred_element_type=jnp.float32)
        )

    h0 = jnp.zeros((b_pad, h_pad), jnp.float32)
    h_t = lax.fori_loop(0, seq_len, step, h0, unroll=unroll)

    # Fused FC head; O is padded to 128 lanes so this store is unmasked.
    out_ref[...] = (
        jnp.dot(h_t, wfc_ref[...], preferred_element_type=jnp.float32)
        + bfc_ref[...]
    ).astype(out_ref.dtype)


def prepare_params(params):
    """One-time parameter re-layout (hoisted out of the forward path).

    Transposes, combines biases, and zero-pads the hidden dim to 128 lanes and
    the output dim to 128 lanes.  Padding with zeros is bit-exact: padded
    hidden lanes stay 0 through the recurrence (tanh(0)=0) and padded W_fc^T
    rows contribute nothing to the output.
    """
    w_ih = params["w_ih"]                    # (H, E)  PyTorch layout
    w_hh = params["w_hh"]                    # (H, H)
    b_ih = params["b_ih"]                    # (H,)
    b_hh = params["b_hh"]                    # (H,)
    w_fc = params["w_fc"]                    # (O, H)
    b_fc = params["b_fc"]                    # (O,)

    hidden_dim, emb_dim = w_ih.shape
    out_dim = w_fc.shape[0]
    h_pad = _round_up(hidden_dim, 128)
    o_pad = _round_up(out_dim, 128)

    wih_t = jnp.zeros((emb_dim, h_pad), jnp.float32).at[:, :hidden_dim].set(w_ih.T)
    whh_t = jnp.zeros((h_pad, h_pad), jnp.float32).at[:hidden_dim, :hidden_dim].set(
        w_hh.T)
    b_comb = jnp.zeros((1, h_pad), jnp.float32).at[:, :hidden_dim].set(
        (b_ih + b_hh).reshape(1, hidden_dim))
    wfc_t = jnp.zeros((h_pad, o_pad), jnp.float32).at[:hidden_dim, :out_dim].set(
        w_fc.T)
    bfc_p = jnp.zeros((1, o_pad), jnp.float32).at[:, :out_dim].set(
        b_fc.reshape(1, out_dim))

    return {
        "embedding": params["embedding"],
        "wih_t": wih_t, "whh_t": whh_t, "b_comb": b_comb,
        "wfc_t": wfc_t, "bfc_p": bfc_p,
        "hidden_dim": hidden_dim, "out_dim": out_dim,
        "h_pad": h_pad, "o_pad": o_pad, "emb_dim": emb_dim,
    }


def rnn_forward_pallas(text, prepped):
    """Full forward pass matching RNN.forward(text).

    text: (seq_len, batch) int32 token ids (PyTorch seq-first convention)
    prepped: output of prepare_params (padded weights, computed once)
    returns: (batch * output_dim,) float32
    """
    seq_len, batch = text.shape
    emb_dim = prepped["emb_dim"]
    h_pad = prepped["h_pad"]
    o_pad = prepped["o_pad"]
    out_dim = prepped["out_dim"]

    # Batch padded to the f32 sublane multiple (8).
    b_pad = _round_up(batch, 8)

    # Pad token ids BEFORE the gather so the (S, B_pad, E) activation is
    # produced directly (no second HBM copy from pad+reshape).  Padded batch
    # rows never mix with real rows and are sliced off at the end.
    # TODO(synk): the gather could be fused into the kernel via scalar-prefetched
    # token ids + a pl.Element row BlockSpec; left in XLA since it is one small gather.
    if b_pad != batch:
        text = jnp.pad(text, ((0, 0), (0, b_pad - batch)))
    embedded = jnp.take(prepped["embedding"], text, axis=0)   # (S, B_pad, E)
    x2d = embedded.reshape(seq_len * b_pad, emb_dim)          # (S*B_pad, E)

    # Cap the unroll: full unroll only for short static sequences.
    unroll = True if seq_len <= 16 else 8

    kernel = functools.partial(rnn_fused_kernel, seq_len=seq_len, b_pad=b_pad,
                               unroll=unroll)

    # Resident VMEM footprint -> vmem_limit_bytes (with headroom, capped well
    # below v7x's 64 MiB physical).
    bytes_x = seq_len * b_pad * emb_dim * 4
    bytes_xp = seq_len * b_pad * h_pad * 4
    bytes_w = (emb_dim * h_pad + h_pad * h_pad + h_pad
               + h_pad * o_pad + o_pad) * 4
    bytes_out = b_pad * o_pad * 4
    footprint = bytes_x + bytes_xp + bytes_w + bytes_out
    vmem_limit = int(min(max(2 * footprint + (2 << 20), 4 << 20), 48 << 20))
    # TODO(synk): for large S*B that exceed this budget (esp. v7x's 64 MiB),
    # switch to a time-chunked grid with h carried in VMEM scratch and x
    # streamed per chunk; and split batch over the 2 v7x TensorCores.

    vmem = pl.BlockSpec(memory_space=pltpu.MemorySpace.VMEM)
    out_padded = pl.pallas_call(
        kernel,
        out_shape=jax.ShapeDtypeStruct((b_pad, o_pad), jnp.float32),
        in_specs=[vmem] * 6,                 # whole arrays resident in VMEM
        out_specs=vmem,
        scratch_shapes=[pltpu.VMEM((seq_len * b_pad, h_pad), jnp.float32)],
        compiler_params=pltpu.CompilerParams(vmem_limit_bytes=vmem_limit),
    )(x2d, prepped["wih_t"], prepped["whh_t"], prepped["b_comb"],
      prepped["wfc_t"], prepped["bfc_p"])

    return out_padded[:batch, :out_dim].reshape(-1)        # matches .view(-1)


def rnn_forward_ref(text, params):
    """Pure-JAX reference (mirrors PyTorch nn.RNN + nn.Linear semantics)."""
    emb = jnp.take(params["embedding"], text, axis=0)      # (S, B, E)
    hidden_dim = params["w_hh"].shape[0]
    batch = text.shape[1]

    def step(h, x_t):
        h_new = jnp.tanh(x_t @ params["w_ih"].T + params["b_ih"]
                         + h @ params["w_hh"].T + params["b_hh"])
        return h_new, None

    h0 = jnp.zeros((batch, hidden_dim), jnp.float32)
    h_t, _ = lax.scan(step, h0, emb)
    out = h_t @ params["w_fc"].T + params["b_fc"]
    return out.reshape(-1)


def init_params(key, input_dim, embedding_dim, hidden_dim, output_dim):
    """Deterministic parameter init mimicking PyTorch default inits."""
    ks = jax.random.split(key, 7)
    k_rnn = 1.0 / jnp.sqrt(hidden_dim)
    k_fc = 1.0 / jnp.sqrt(hidden_dim)
    return {
        "embedding": jax.random.normal(ks[0], (input_dim, embedding_dim), jnp.float32),
        "w_ih": jax.random.uniform(ks[1], (hidden_dim, embedding_dim), jnp.float32,
                                   -k_rnn, k_rnn),
        "w_hh": jax.random.uniform(ks[2], (hidden_dim, hidden_dim), jnp.float32,
                                   -k_rnn, k_rnn),
        "b_ih": jax.random.uniform(ks[3], (hidden_dim,), jnp.float32, -k_rnn, k_rnn),
        "b_hh": jax.random.uniform(ks[4], (hidden_dim,), jnp.float32, -k_rnn, k_rnn),
        "w_fc": jax.random.uniform(ks[5], (output_dim, hidden_dim), jnp.float32,
                                   -k_fc, k_fc),
        "b_fc": jax.random.uniform(ks[6], (output_dim,), jnp.float32, -k_fc, k_fc),
    }


if __name__ == "__main__":
    # Small, forward-consistent shapes.
    INPUT_DIM = 100       # vocab size
    EMBEDDING_DIM = 32
    HIDDEN_DIM = 32
    OUTPUT_DIM = 1
    SEQ_LEN = 8
    BATCH = 2

    key = jax.random.PRNGKey(0)
    k_param, k_text = jax.random.split(key)
    params = init_params(k_param, INPUT_DIM, EMBEDDING_DIM, HIDDEN_DIM, OUTPUT_DIM)
    text = jax.random.randint(k_text, (SEQ_LEN, BATCH), 0, INPUT_DIM, jnp.int32)

    # One-time weight re-layout (cached; not part of the per-call forward path).
    prepped = jax.tree_util.tree_map(
        lambda x: jax.block_until_ready(x) if isinstance(x, jax.Array) else x,
        prepare_params(params))

    out = jax.block_until_ready(rnn_forward_pallas(text, prepped))
    ref = jax.block_until_ready(rnn_forward_ref(text, params))

    assert out.shape == (BATCH * OUTPUT_DIM,)
    assert jnp.allclose(out, ref, atol=1e-4, rtol=1e-4), (out, ref)
    print("KERNEL_OK")
</pallas_src>

<mosaic_0001>
module attributes {stable_mosaic.version = 11 : i64} {
  func.func @rnn_fused_kernel(%arg0: memref<64x32xf32, #tpu.memory_space<vmem>>, %arg1: memref<32x128xf32, #tpu.memory_space<vmem>>, %arg2: memref<128x128xf32, #tpu.memory_space<vmem>>, %arg3: memref<1x128xf32, #tpu.memory_space<vmem>>, %arg4: memref<128x128xf32, #tpu.memory_space<vmem>>, %arg5: memref<1x128xf32, #tpu.memory_space<vmem>>, %arg6: memref<8x128xf32, #tpu.memory_space<vmem>>, %arg7: memref<64x128xf32, #tpu.memory_space<vmem>>) attributes {dimension_semantics = [], scalar_prefetch = 0 : i64, scratch_operands = 1 : i64, tpu.core_type = #tpu.core_type<tc>} {
    %c0 = arith.constant 0 : index
    %c0_0 = arith.constant 0 : index
    %0 = vector.load %arg0[%c0, %c0_0] : memref<64x32xf32, #tpu.memory_space<vmem>>, vector<8x32xf32>
    %c0_1 = arith.constant 0 : index
    %c0_2 = arith.constant 0 : index
    %1 = vector.load %arg1[%c0_1, %c0_2] : memref<32x128xf32, #tpu.memory_space<vmem>>, vector<32x128xf32>
    %cst = arith.constant dense<0.000000e+00> : vector<8x128xf32>
    %2 = tpu.matmul %0, %1, %cst {dimension_numbers = #tpu.dot_dimension_numbers<[1], [0], [0], [1], [0, 0, 1, 1], [], []>} : vector<8x32xf32>, vector<32x128xf32>, vector<8x128xf32> -> vector<8x128xf32>
    %c0_3 = arith.constant 0 : index
    %c0_4 = arith.constant 0 : index
    %3 = vector.load %arg3[%c0_3, %c0_4] : memref<1x128xf32, #tpu.memory_space<vmem>>, vector<1x128xf32>
    %4 = vector.broadcast %3 : vector<1x128xf32> to vector<8x128xf32>
    %5 = arith.addf %2, %4 : vector<8x128xf32>
    %c0_5 = arith.constant 0 : index
    %c0_6 = arith.constant 0 : index
    %6 = vector.load %arg7[%c0_5, %c0_6] : memref<64x128xf32, #tpu.memory_space<vmem>>, vector<8x128xf32>
    tpu.vector_store %arg7[%c0_5, %c0_6], %5 {strides = array<i32>} : memref<64x128xf32, #tpu.memory_space<vmem>>, vector<8x128xf32>,
    %c8 = arith.constant 8 : index
    %c0_7 = arith.constant 0 : index
    %7 = vector.load %arg0[%c8, %c0_7] : memref<64x32xf32, #tpu.memory_space<vmem>>, vector<56x32xf32>
    %c0_8 = arith.constant 0 : index
    %c0_9 = arith.constant 0 : index
    %8 = vector.load %arg1[%c0_8, %c0_9] : memref<32x128xf32, #tpu.memory_space<vmem>>, vector<32x128xf32>
    %cst_10 = arith.constant dense<0.000000e+00> : vector<56x128xf32>
    %9 = tpu.matmul %7, %8, %cst_10 {dimension_numbers = #tpu.dot_dimension_numbers<[1], [0], [0], [1], [0, 0, 1, 1], [], []>} : vector<56x32xf32>, vector<32x128xf32>, vector<56x128xf32> -> vector<56x128xf32>
    %c0_11 = arith.constant 0 : index
    %c0_12 = arith.constant 0 : index
    %10 = vector.load %arg3[%c0_11, %c0_12] : memref<1x128xf32, #tpu.memory_space<vmem>>, vector<1x128xf32>
    %11 = vector.broadcast %10 : vector<1x128xf32> to vector<56x128xf32>
    %12 = arith.addf %9, %11 : vector<56x128xf32>
    %c8_13 = arith.constant 8 : index
    %c0_14 = arith.constant 0 : index
    %13 = vector.load %arg7[%c8_13, %c0_14] : memref<64x128xf32, #tpu.memory_space<vmem>>, vector<56x128xf32>
    tpu.vector_store %arg7[%c8_13, %c0_14], %12 {strides = array<i32>} : memref<64x128xf32, #tpu.memory_space<vmem>>, vector<56x128xf32>,
    %cst_15 = arith.constant 0.000000e+00 : f32
    %14 = vector.broadcast %cst_15 : f32 to vector<8x128xf32>
    %c0_i32 = arith.constant 0 : i32
    %c8_i32 = arith.constant 8 : i32
    %15 = arith.muli %c0_i32, %c8_i32 : i32
    %16 = tpu.assume_multiple %15, 8 : i32
    %17 = arith.index_cast %16 : i32 to index
    %c0_16 = arith.constant 0 : index
    %18 = vector.load %arg7[%17, %c0_16] : memref<64x128xf32, #tpu.memory_space<vmem>>, vector<8x128xf32>
    %c0_17 = arith.constant 0 : index
    %c0_18 = arith.constant 0 : index
    %19 = vector.load %arg2[%c0_17, %c0_18] : memref<128x128xf32, #tpu.memory_space<vmem>>, vector<128x128xf32>
    %cst_19 = arith.constant dense<0.000000e+00> : vector<8x128xf32>
    %20 = tpu.matmul %14, %19, %cst_19 {dimension_numbers = #tpu.dot_dimension_numbers<[1], [0], [0], [1], [0, 0, 1, 1], [], []>} : vector<8x128xf32>, vector<128x128xf32>, vector<8x128xf32> -> vector<8x128xf32>
    %21 = arith.addf %18, %20 : vector<8x128xf32>
    %22 = math.tanh %21 : vector<8x128xf32>
    %c1_i32 = arith.constant 1 : i32
    %c8_i32_20 = arith.constant 8 : i32
    %23 = arith.muli %c1_i32, %c8_i32_20 : i32
    %24 = tpu.assume_multiple %23, 8 : i32
    %25 = arith.index_cast %24 : i32 to index
    %c0_21 = arith.constant 0 : index
    %26 = vector.load %arg7[%25, %c0_21] : memref<64x128xf32, #tpu.memory_space<vmem>>, vector<8x128xf32>
    %c0_22 = arith.constant 0 : index
    %c0_23 = arith.constant 0 : index
    %27 = vector.load %arg2[%c0_22, %c0_23] : memref<128x128xf32, #tpu.memory_space<vmem>>, vector<128x128xf32>
    %cst_24 = arith.constant dense<0.000000e+00> : vector<8x128xf32>
    %28 = tpu.matmul %22, %27, %cst_24 {dimension_numbers = #tpu.dot_dimension_numbers<[1], [0], [0], [1], [0, 0, 1, 1], [], []>} : vector<8x128xf32>, vector<128x128xf32>, vector<8x128xf32> -> vector<8x128xf32>
    %29 = arith.addf %26, %28 : vector<8x128xf32>
    %30 = math.tanh %29 : vector<8x128xf32>
    %c2_i32 = arith.constant 2 : i32
    %c8_i32_25 = arith.constant 8 : i32
    %31 = arith.muli %c2_i32, %c8_i32_25 : i32
    %32 = tpu.assume_multiple %31, 8 : i32
    %33 = arith.index_cast %32 : i32 to index
    %c0_26 = arith.constant 0 : index
    %34 = vector.load %arg7[%33, %c0_26] : memref<64x128xf32, #tpu.memory_space<vmem>>, vector<8x128xf32>
    %c0_27 = arith.constant 0 : index
    %c0_28 = arith.constant 0 : index
    %35 = vector.load %arg2[%c0_27, %c0_28] : memref<128x128xf32, #tpu.memory_space<vmem>>, vector<128x128xf32>
    %cst_29 = arith.constant dense<0.000000e+00> : vector<8x128xf32>
    %36 = tpu.matmul %30, %35, %cst_29 {dimension_numbers = #tpu.dot_dimension_numbers<[1], [0], [0], [1], [0, 0, 1, 1], [], []>} : vector<8x128xf32>, vector<128x128xf32>, vector<8x128xf32> -> vector<8x128xf32>
    %37 = arith.addf %34, %36 : vector<8x128xf32>
    %38 = math.tanh %37 : vector<8x128xf32>
    %c3_i32 = arith.constant 3 : i32
    %c8_i32_30 = arith.constant 8 : i32
    %39 = arith.muli %c3_i32, %c8_i32_30 : i32
    %40 = tpu.assume_multiple %39, 8 : i32
    %41 = arith.index_cast %40 : i32 to index
    %c0_31 = arith.constant 0 : index
    %42 = vector.load %arg7[%41, %c0_31] : memref<64x128xf32, #tpu.memory_space<vmem>>, vector<8x128xf32>
    %c0_32 = arith.constant 0 : index
    %c0_33 = arith.constant 0 : index
    %43 = vector.load %arg2[%c0_32, %c0_33] : memref<128x128xf32, #tpu.memory_space<vmem>>, vector<128x128xf32>
    %cst_34 = arith.constant dense<0.000000e+00> : vector<8x128xf32>
    %44 = tpu.matmul %38, %43, %cst_34 {dimension_numbers = #tpu.dot_dimension_numbers<[1], [0], [0], [1], [0, 0, 1, 1], [], []>} : vector<8x128xf32>, vector<128x128xf32>, vector<8x128xf32> -> vector<8x128xf32>
    %45 = arith.addf %42, %44 : vector<8x128xf32>
    %46 = math.tanh %45 : vector<8x128xf32>
    %c4_i32 = arith.constant 4 : i32
    %c8_i32_35 = arith.constant 8 : i32
    %47 = arith.muli %c4_i32, %c8_i32_35 : i32
    %48 = tpu.assume_multiple %47, 8 : i32
    %49 = arith.index_cast %48 : i32 to index
    %c0_36 = arith.constant 0 : index
    %50 = vector.load %arg7[%49, %c0_36] : memref<64x128xf32, #tpu.memory_space<vmem>>, vector<8x128xf32>
    %c0_37 = arith.constant 0 : index
    %c0_38 = arith.constant 0 : index
    %51 = vector.load %arg2[%c0_37, %c0_38] : memref<128x128xf32, #tpu.memory_space<vmem>>, vector<128x128xf32>
    %cst_39 = arith.constant dense<0.000000e+00> : vector<8x128xf32>
    %52 = tpu.matmul %46, %51, %cst_39 {dimension_numbers = #tpu.dot_dimension_numbers<[1], [0], [0], [1], [0, 0, 1, 1], [], []>} : vector<8x128xf32>, vector<128x128xf32>, vector<8x128xf32> -> vector<8x128xf32>
    %53 = arith.addf %50, %52 : vector<8x128xf32>
    %54 = math.tanh %53 : vector<8x128xf32>
    %c5_i32 = arith.constant 5 : i32
    %c8_i32_40 = arith.constant 8 : i32
    %55 = arith.muli %c5_i32, %c8_i32_40 : i32
    %56 = tpu.assume_multiple %55, 8 : i32
    %57 = arith.index_cast %56 : i32 to index
    %c0_41 = arith.constant 0 : index
    %58 = vector.load %arg7[%57, %c0_41] : memref<64x128xf32, #tpu.memory_space<vmem>>, vector<8x128xf32>
    %c0_42 = arith.constant 0 : index
    %c0_43 = arith.constant 0 : index
    %59 = vector.load %arg2[%c0_42, %c0_43] : memref<128x128xf32, #tpu.memory_space<vmem>>, vector<128x128xf32>
    %cst_44 = arith.constant dense<0.000000e+00> : vector<8x128xf32>
    %60 = tpu.matmul %54, %59, %cst_44 {dimension_numbers = #tpu.dot_dimension_numbers<[1], [0], [0], [1], [0, 0, 1, 1], [], []>} : vector<8x128xf32>, vector<128x128xf32>, vector<8x128xf32> -> vector<8x128xf32>
    %61 = arith.addf %58, %60 : vector<8x128xf32>
    %62 = math.tanh %61 : vector<8x128xf32>
    %c6_i32 = arith.constant 6 : i32
    %c8_i32_45 = arith.constant 8 : i32
    %63 = arith.muli %c6_i32, %c8_i32_45 : i32
    %64 = tpu.assume_multiple %63, 8 : i32
    %65 = arith.index_cast %64 : i32 to index
    %c0_46 = arith.constant 0 : index
    %66 = vector.load %arg7[%65, %c0_46] : memref<64x128xf32, #tpu.memory_space<vmem>>, vector<8x128xf32>
    %c0_47 = arith.constant 0 : index
    %c0_48 = arith.constant 0 : index
    %67 = vector.load %arg2[%c0_47, %c0_48] : memref<128x128xf32, #tpu.memory_space<vmem>>, vector<128x128xf32>
    %cst_49 = arith.constant dense<0.000000e+00> : vector<8x128xf32>
    %68 = tpu.matmul %62, %67, %cst_49 {dimension_numbers = #tpu.dot_dimension_numbers<[1], [0], [0], [1], [0, 0, 1, 1], [], []>} : vector<8x128xf32>, vector<128x128xf32>, vector<8x128xf32> -> vector<8x128xf32>
    %69 = arith.addf %66, %68 : vector<8x128xf32>
    %70 = math.tanh %69 : vector<8x128xf32>
    %c7_i32 = arith.constant 7 : i32
    %c8_i32_50 = arith.constant 8 : i32
    %71 = arith.muli %c7_i32, %c8_i32_50 : i32
    %72 = tpu.assume_multiple %71, 8 : i32
    %73 = arith.index_cast %72 : i32 to index
    %c0_51 = arith.constant 0 : index
    %74 = vector.load %arg7[%73, %c0_51] : memref<64x128xf32, #tpu.memory_space<vmem>>, vector<8x128xf32>
    %c0_52 = arith.constant 0 : index
    %c0_53 = arith.constant 0 : index
    %75 = vector.load %arg2[%c0_52, %c0_53] : memref<128x128xf32, #tpu.memory_space<vmem>>, vector<128x128xf32>
    %cst_54 = arith.constant dense<0.000000e+00> : vector<8x128xf32>
    %76 = tpu.matmul %70, %75, %cst_54 {dimension_numbers = #tpu.dot_dimension_numbers<[1], [0], [0], [1], [0, 0, 1, 1], [], []>} : vector<8x128xf32>, vector<128x128xf32>, vector<8x128xf32> -> vector<8x128xf32>
    %77 = arith.addf %74, %76 : vector<8x128xf32>
    %78 = math.tanh %77 : vector<8x128xf32>
    %c8_i32_55 = arith.constant 8 : i32
    %c0_56 = arith.constant 0 : index
    %c0_57 = arith.constant 0 : index
    %79 = vector.load %arg4[%c0_56, %c0_57] : memref<128x128xf32, #tpu.memory_space<vmem>>, vector<128x128xf32>
    %cst_58 = arith.constant dense<0.000000e+00> : vector<8x128xf32>
    %80 = tpu.matmul %78, %79, %cst_58 {dimension_numbers = #tpu.dot_dimension_numbers<[1], [0], [0], [1], [0, 0, 1, 1], [], []>} : vector<8x128xf32>, vector<128x128xf32>, vector<8x128xf32> -> vector<8x128xf32>
    %c0_59 = arith.constant 0 : index
    %c0_60 = arith.constant 0 : index
    %81 = vector.load %arg5[%c0_59, %c0_60] : memref<1x128xf32, #tpu.memory_space<vmem>>, vector<1x128xf32>
    %82 = vector.broadcast %81 : vector<1x128xf32> to vector<8x128xf32>
    %83 = arith.addf %80, %82 : vector<8x128xf32>
    %c0_61 = arith.constant 0 : index
    %c0_62 = arith.constant 0 : index
    %84 = vector.load %arg6[%c0_61, %c0_62] : memref<8x128xf32, #tpu.memory_space<vmem>>, vector<8x128xf32>
    tpu.vector_store %arg6[%c0_61, %c0_62], %83 {strides = array<i32>} : memref<8x128xf32, #tpu.memory_space<vmem>>, vector<8x128xf32>,
    return
  }
}

</mosaic_0001>

<bundles_post_ra>
// kernel: tpu_custom_call.1
= control target key start
LH: loop header
LB: loop body
LE: loop exit
PB: predicated region body
PF: predicated region fallthrough
CT: control target
= control target key end

     0   :  { %11 = vsyncpa [#allocation4], 0  ;;  %s2102_s0 = inlined_call_operand.vmem [shape: f32[64,32], index: 0, kind: input, shape index: {}]   ;;  %s2103_s1 = inlined_call_operand.vmem [shape: f32[32,128], index: 1, kind: input, shape index: {}]   ;;  %s2104_s2 = inlined_call_operand.hbm [shape: f32[128,128], index: 2, kind: input, shape index: {}]   ;;  %s2105_s3 = inlined_call_operand.vmem [shape: f32[1,128], index: 3, kind: input, shape index: {}]   ;;  %s2106_s4 = inlined_call_operand.hbm [shape: f32[128,128], index: 4, kind: input, shape index: {}]   ;;  %s2107_s5 = inlined_call_operand.vmem [shape: f32[1,128], index: 5, kind: input, shape index: {}]   ;;  %s2108_s6 = inlined_call_operand.hbm [shape: f32[8,128], index: 6, kind: output, shape index: {}]  }
   0x1   :  { %12 = vsyncpa [#allocation7], 0 }
   0x2   :  { %13 = vsyncpa [#allocation5], 0  ;;  %s1626_s21 = smov [#allocation3]  }
   0x3   :  { %s23_s22 = sshll.u32 %s1626_s21, 4  ;;  %s24_s22 = int_to_ptr.vmem [resolvable:$true] %s23_s22 }
   0x4   :  { %s1568_s23 = scalar_lea.vmem %s24_s22, 2048  ;;  %p1573_p1 = scmp.lt.s32.totalorder %s24_s22, %s24_s22 }
   0x5   :  { %p1569_p0 = scmp.ne.s32.totalorder %s24_s22, %s1568_s23  ;;  %p1574_p2 = scmp.lt.s32.totalorder %s1568_s23, %s1568_s23 }
   0x7   :  { %p1575_p3 = por %p1574_p2, %p1573_p1 }
   0x9   :  { %p1576_p4 = pnand %p1575_p3, %p1569_p0 }
   0xb   :  { %1579 = shalt.err (!%p1576_p4)
}
   0xc   :  { %s1627_s24 = smov 128   ;;  %s1628_s25 = smov 8  }
   0xd   :  { %29 = dma.hbm_to_vmem [thread:$0]  %s2104_s2, 2048, %s24_s22, [#allocation4], %s1627_s24, %s1627_s24, %s1628_s25  }
   0xe   :  { %s1629_s28 = smov [#allocation6]  }
   0xf   :  { %s37_s29 = sshll.u32 %s1629_s28, 4  ;;  %s38_s29 = int_to_ptr.vmem [resolvable:$true] %s37_s29 }
  0x10   :  { %s1588_s30 = scalar_lea.vmem %s38_s29, 2048  ;;  %p1593_p6 = scmp.lt.s32.totalorder %s38_s29, %s38_s29 }
  0x11   :  { %p1589_p5 = scmp.ne.s32.totalorder %s38_s29, %s1588_s30  ;;  %p1594_p7 = scmp.lt.s32.totalorder %s1588_s30, %s1588_s30 }
  0x13   :  { %p1595_p8 = por %p1594_p7, %p1593_p6 }
  0x15   :  { %p1596_p9 = pnand %p1595_p8, %p1589_p5 }
  0x17   :  { %1599 = shalt.err (!%p1596_p9)
}
  0x18   :  { %43 = dma.hbm_to_vmem [thread:$0]  %s2106_s4, 2048, %s38_s29, [#allocation7], %s1627_s24, %s1627_s24, %s1628_s25  }
  0x19   :  { %1620 = dma.done.wait [#allocation4], 2048  }
  0x1a   :  { %1621 = vsyncadd [#allocation4], 4294965248 }
  0x1b   :  { %1622 = dma.done.wait [#allocation7], 2048  }
  0x1c   :  { %1623 = vsyncadd [#allocation7], 4294965248  ;;  %v1630_v0 = vmov 0.0   ;;  %vm1631_vm0 = vmmov 0   ;;  %v1680_v1 = vld [vmem:[#allocation3 + $0x78] sm:$0xff]  ;;  %v1682_v2 = vld [vmem:[#allocation3 + $0x70] sm:$0xff] }
  0x1d   :  { %1222 = vmatprep.subr.mxu0 %v1630_v0  ;;  %1182 = vmatprep.subr.mxu1 %v1630_v0  ;;  %v1686_v3 = vld [vmem:[#allocation3 + $0x68] sm:$0xff]  ;;  %v56_v4 = vld [vmem:[%s2103_s1 + $0x18] sm:$0xff]  ;;  %v1693_v5 = vld [vmem:[#allocation3 + $0x60] sm:$0xff]  ;;  %vm64_vm1 = vcmask 261120   ;;  %s1632_s8 = smov [#allocation8]  }
  0x1e   :  { %1190 = vmatprep.mubr.msk.f32.mxu1 %vm1631_vm0, %v1630_v0  ;;  %1254 = vmatprep.mubr.msk.f32.mxu0 %vm1631_vm0, %v1630_v0  ;;  %v55_v6 = vld [vmem:[%s2103_s1 + $0x10] sm:$0xff]  ;;  %v54_v7 = vld [vmem:[%s2103_s1 + $0x8] sm:$0xff]  ;;  %v1704_v8 = vld [vmem:[#allocation3 + $0x58] sm:$0xff]  ;;  %s992_s2 = sshll.u32 %s1632_s8, 4  ;;  %s993_s2 = int_to_ptr.vmem [resolvable:$true] %s992_s2 }
  0x1f   :  { %1223 = vmatpush3.msra.mxu0 %v1680_v1  ;;  %1183 = vmatpush3.msra.mxu1 %v56_v4  ;;  %v53_v9 = vld [vmem:[%s2103_s1] sm:$0xff]  ;;  %v1712_v10 = vld [vmem:[#allocation3 + $0x50] sm:$0xff]  ;;  %v1720_v12 = vld [vmem:[#allocation3 + $0x48] sm:$0xff]  ;;  %s1600_s4 = scalar_lea.vmem %s993_s2, 128  ;;  %p1605_p11 = scmp.lt.s32.totalorder %s993_s2, %s993_s2 }
  0x20   :  { %1224 = vmatprep.subr.mxu0 %v1630_v0  ;;  %1184 = vmatprep.subr.mxu1 %v1630_v0  ;;  %v52_v11 = vld [vmem:[%s2102_s0] sm:$0xff]  ;;  %v1730_v14 = vld [vmem:[#allocation3 + $0x38] sm:$0xff]  ;;  %v1735_v15 = vld [vmem:[#allocation3 + $0x30] sm:$0xff]  ;;  %p1601_p10 = scmp.ne.s32.totalorder %s993_s2, %s1600_s4  ;;  %p1606_p12 = scmp.lt.s32.totalorder %s1600_s4, %s1600_s4 }
  0x21   :  { %1225 = vmatpush3.msra.mxu0 %v1682_v2  ;;  %1185 = vmatpush3.msra.mxu1 %v55_v6  ;;  %v1725_v13 = vld [vmem:[#allocation3 + $0x40] sm:$0xff]  ;;  %v1740_v16 = vld [vmem:[#allocation3 + $0x28] sm:$0xff]  ;;  %v1755_v19 = vld [vmem:[#allocation3 + $0x18] sm:$0xff] }
  0x22   :  { %1226 = vmatprep.subr.mxu0 %v1630_v0  ;;  %1186 = vmatprep.subr.mxu1 %v1630_v0  ;;  %v139_v17 = vld [vmem:[%s2102_s0 + $0x8] sm:$0xff]  ;;  %v1748_v18 = vld [vmem:[#allocation3 + $0x20] sm:$0xff]  ;;  %v1761_v20 = vld [vmem:[#allocation3 + $0x10] sm:$0xff]  ;;  %p1607_p13 = por %p1606_p12, %p1605_p11 }
  0x23   :  { %1227 = vmatpush3.msra.mxu0 %v1686_v3  ;;  %1187 = vmatpush3.msra.mxu1 %v54_v7  ;;  %v1767_v21 = vld [vmem:[#allocation3 + $0x8] sm:$0xff]  ;;  %v140_v22 = vld [vmem:[%s2102_s0 + $0x10] sm:$0xff]  ;;  %v1777_v23 = vld [vmem:[#allocation3] sm:$0xff] }
  0x24   :  { %1228 = vmatprep.subr.mxu0 %v1630_v0  ;;  %1188 = vmatprep.subr.mxu1 %v1630_v0  ;;  %v141_v24 = vld [vmem:[%s2102_s0 + $0x18] sm:$0xff]  ;;  %v142_v25 = vld [vmem:[%s2102_s0 + $0x20] sm:$0xff]  ;;  %v143_v26 = vld [vmem:[%s2102_s0 + $0x28] sm:$0xff]  ;;  %p1608_p0 = pnand %p1607_p13, %p1601_p10 }
  0x25   :  { %1229 = vmatpush3.msra.mxu0 %v1693_v5  ;;  %1189 = vmatpush3.msra.mxu1 %v53_v9  ;;  %v144_v27 = vld [vmem:[%s2102_s0 + $0x30] sm:$0xff]  ;;  %v145_v28 = vld [vmem:[%s2102_s0 + $0x38] sm:$0xff]  ;;  %v1882_v33 = vld [vmem:[%s2105_s3] ss:$0 sm:$0xff] }
  0x26   :  { %1230 = vmatprep.subr.mxu0 %v1630_v0  ;;  %1191 = vmatmul.mubr.msk.f32.vlgmr.msra.gmra.mxu1 %vm64_vm1, %v52_v11 }
  0x27   :  { %1231 = vmatpush3.msra.mxu0 %v1704_v8  ;;  %1193 = vmatprep.subr.mxu1 %v1630_v0 }
  0x28   :  { %1232 = vmatprep.subr.mxu0 %v1630_v0  ;;  %1194 = vmatpush3.msra.mxu1 %v56_v4 }
  0x29   :  { %1233 = vmatpush3.msra.mxu0 %v1712_v10  ;;  %1195 = vmatprep.subr.mxu1 %v1630_v0 }
  0x2a   :  { %1234 = vmatprep.subr.mxu0 %v1630_v0  ;;  %1196 = vmatpush3.msra.mxu1 %v55_v6 }
  0x2b   :  { %1235 = vmatpush3.msra.mxu0 %v1720_v12  ;;  %1197 = vmatprep.subr.mxu1 %v1630_v0 }
  0x2c   :  { %1236 = vmatprep.subr.mxu0 %v1630_v0  ;;  %1198 = vmatpush3.msra.mxu1 %v54_v7 }
  0x2d   :  { %1237 = vmatpush3.msra.mxu0 %v1725_v13  ;;  %1199 = vmatprep.subr.mxu1 %v1630_v0 }
  0x2e   :  { %1238 = vmatprep.subr.mxu0 %v1630_v0  ;;  %1200 = vmatpush3.msra.mxu1 %v53_v9 }
  0x2f   :  { %1239 = vmatpush3.msra.mxu0 %v1730_v14  ;;  %1201 = vmatprep.mubr.msk.f32.mxu1 %vm1631_vm0, %v1630_v0 }
  0x30   :  { %1240 = vmatprep.subr.mxu0 %v1630_v0  ;;  %1202 = vmatmul.mubr.msk.f32.vlgmr.msra.gmra.mxu1 %vm64_vm1, %v139_v17 }
  0x31   :  { %1241 = vmatpush3.msra.mxu0 %v1735_v15  ;;  %1257 = vmatprep.subr.mxu1 %v1630_v0 }
  0x32   :  { %1242 = vmatprep.subr.mxu0 %v1630_v0  ;;  %1258 = vmatpush3.msra.mxu1 %v1680_v1 }
  0x33   :  { %1243 = vmatpush3.msra.mxu0 %v1740_v16  ;;  %1259 = vmatprep.subr.mxu1 %v1630_v0 }
  0x34   :  { %1244 = vmatprep.subr.mxu0 %v1630_v0  ;;  %1260 = vmatpush3.msra.mxu1 %v1682_v2 }
  0x35   :  { %1245 = vmatpush3.msra.mxu0 %v1748_v18  ;;  %1261 = vmatprep.subr.mxu1 %v1630_v0 }
  0x36   :  { %1246 = vmatprep.subr.mxu0 %v1630_v0  ;;  %1204 = vmatprep.mubr.msk.f32.mxu1 %vm1631_vm0, %v1630_v0 }
  0x37   :  { %1247 = vmatpush3.msra.mxu0 %v1755_v19  ;;  %1262 = vmatpush3.msra.mxu1 %v1686_v3 }
  0x38   :  { %1248 = vmatprep.subr.mxu0 %v1630_v0  ;;  %1205 = vmatmul.mubr.msk.f32.gmra.mxu1 %vm64_vm1, %v140_v22 }
  0x39   :  { %1249 = vmatpush3.msra.mxu0 %v1761_v20  ;;  %1263 = vmatprep.subr.mxu1 %v1630_v0 }
  0x3a   :  { %1250 = vmatprep.subr.mxu0 %v1630_v0  ;;  %1264 = vmatpush3.msra.mxu1 %v1693_v5 }
  0x3b   :  { %1251 = vmatpush3.msra.mxu0 %v1767_v21  ;;  %1265 = vmatprep.subr.mxu1 %v1630_v0 }
  0x3c   :  { %1252 = vmatprep.subr.mxu0 %v1630_v0  ;;  %1207 = vmatprep.mubr.msk.f32.mxu1 %vm1631_vm0, %v1630_v0 }
  0x3d   :  { %1253 = vmatpush3.msra.mxu0 %v1777_v23  ;;  %1266 = vmatpush3.msra.mxu1 %v1704_v8 }
  0x3e   :  { %1255 = vmatmul.mubr.f32.vlgmr.msra.gmra.mxu0 %v1630_v0  ;;  %1208 = vmatmul.mubr.msk.f32.gmra.mxu1 %vm64_vm1, %v141_v24 }
  0x3f   :  { %1267 = vmatprep.subr.mxu1 %v1630_v0  ;;  %1210 = vmatprep.mubr.msk.f32.mxu1 %vm1631_vm0, %v1630_v0 }
  0x40   :  { %1268 = vmatpush3.msra.mxu1 %v1712_v10  ;;  %1292 = vmatprep.subr.mxu0 %v1630_v0 }
  0x41   :  { %1269 = vmatprep.subr.mxu1 %v1630_v0  ;;  %1293 = vmatpush3.msra.mxu0 %v1680_v1 }
  0x42   :  { %1270 = vmatpush3.msra.mxu1 %v1720_v12  ;;  %1294 = vmatprep.subr.mxu0 %v1630_v0 }
  0x43   :  { %1271 = vmatprep.subr.mxu1 %v1630_v0  ;;  %1295 = vmatpush3.msra.mxu0 %v1682_v2 }
  0x44   :  { %1272 = vmatpush3.msra.mxu1 %v1725_v13  ;;  %1296 = vmatprep.subr.mxu0 %v1630_v0 }
  0x45   :  { %1273 = vmatprep.subr.mxu1 %v1630_v0  ;;  %1297 = vmatpush3.msra.mxu0 %v1686_v3 }
  0x46   :  { %1274 = vmatpush3.msra.mxu1 %v1730_v14  ;;  %1298 = vmatprep.subr.mxu0 %v1630_v0 }
  0x47   :  { %1275 = vmatprep.subr.mxu1 %v1630_v0  ;;  %1299 = vmatpush3.msra.mxu0 %v1693_v5 }
  0x48   :  { %1276 = vmatpush3.msra.mxu1 %v1735_v15  ;;  %1300 = vmatprep.subr.mxu0 %v1630_v0 }
  0x49   :  { %1277 = vmatprep.subr.mxu1 %v1630_v0  ;;  %1301 = vmatpush3.msra.mxu0 %v1704_v8 }
  0x4a   :  { %1278 = vmatpush3.msra.mxu1 %v1740_v16  ;;  %1302 = vmatprep.subr.mxu0 %v1630_v0 }
  0x4b   :  { %1279 = vmatprep.subr.mxu1 %v1630_v0  ;;  %1303 = vmatpush3.msra.mxu0 %v1712_v10 }
  0x4c   :  { %1280 = vmatpush3.msra.mxu1 %v1748_v18  ;;  %1304 = vmatprep.subr.mxu0 %v1630_v0 }
  0x4d   :  { %1281 = vmatprep.subr.mxu1 %v1630_v0  ;;  %1305 = vmatpush3.msra.mxu0 %v1720_v12 }
  0x4e   :  { %1282 = vmatpush3.msra.mxu1 %v1755_v19  ;;  %1306 = vmatprep.subr.mxu0 %v1630_v0 }
  0x4f   :  { %1283 = vmatprep.subr.mxu1 %v1630_v0  ;;  %1307 = vmatpush3.msra.mxu0 %v1725_v13 }
  0x50   :  { %1284 = vmatpush3.msra.mxu1 %v1761_v20  ;;  %1308 = vmatprep.subr.mxu0 %v1630_v0 }
  0x51   :  { %1285 = vmatprep.subr.mxu1 %v1630_v0  ;;  %1309 = vmatpush3.msra.mxu0 %v1730_v14 }
  0x52   :  { %1286 = vmatpush3.msra.mxu1 %v1767_v21  ;;  %1310 = vmatprep.subr.mxu0 %v1630_v0 }
  0x53   :  { %1287 = vmatprep.subr.mxu1 %v1630_v0  ;;  %1311 = vmatpush3.msra.mxu0 %v1735_v15 }
  0x54   :  { %1288 = vmatpush3.msra.mxu1 %v1777_v23  ;;  %1312 = vmatprep.subr.mxu0 %v1630_v0 }
  0x55   :  { %1324 = vmatprep.mubr.msk.f32.mxu0 %vm1631_vm0, %v1630_v0  ;;  %1313 = vmatpush3.msra.mxu0 %v1740_v16 }
  0x56   :  { %1327 = vmatprep.subr.mxu1 %v1630_v0  ;;  %1314 = vmatprep.subr.mxu0 %v1630_v0 }
  0x57   :  { %1315 = vmatpush3.msra.mxu0 %v1748_v18  ;;  %1211 = vmatmul.mubr.msk.f32.gmra.mxu1 %vm64_vm1, %v142_v25  ;;  %v900_v25 = vld [vmem:[#allocation6 + $0x40] sm:$0xff] }
  0x58   :  { %1316 = vmatprep.subr.mxu0 %v1630_v0  ;;  %1213 = vmatprep.mubr.msk.f32.mxu1 %vm1631_vm0, %v1630_v0 }
  0x59   :  { %1317 = vmatpush3.msra.mxu0 %v1755_v19 }
  0x5a   :  { %1318 = vmatprep.subr.mxu0 %v1630_v0 }
  0x5b   :  { %1319 = vmatpush3.msra.mxu0 %v1761_v20  ;;  %1214 = vmatmul.mubr.msk.f32.gmra.mxu1 %vm64_vm1, %v143_v26  ;;  %v899_v26 = vld [vmem:[#allocation6 + $0x38] sm:$0xff] }
  0x5c   :  { %1320 = vmatprep.subr.mxu0 %v1630_v0  ;;  %1216 = vmatprep.mubr.msk.f32.mxu1 %vm1631_vm0, %v1630_v0 }
  0x5d   :  { %1321 = vmatpush3.msra.mxu0 %v1767_v21 }
  0x5e   :  { %1322 = vmatprep.subr.mxu0 %v1630_v0 }
  0x5f   :  { %1323 = vmatpush3.msra.mxu0 %v1777_v23  ;;  %1217 = vmatmul.mubr.msk.f32.gmra.mxu1 %vm64_vm1, %v144_v27  ;;  %v898_v27 = vld [vmem:[#allocation6 + $0x30] sm:$0xff] }
  0x60   :  { %1362 = vmatprep.subr.mxu0 %v1630_v0  ;;  %1219 = vmatprep.mubr.msk.f32.mxu1 %vm1631_vm0, %v1630_v0 }
  0x63   :  { %1220 = vmatmul.mubr.msk.f32.gmra.mxu1 %vm64_vm1, %v145_v28  ;;  %v897_v28 = vld [vmem:[#allocation6 + $0x28] sm:$0xff] }
  0x64   :  { %1289 = vmatprep.mubr.msk.f32.mxu1 %vm1631_vm0, %v1630_v0 }
  0xe6   :  { %v134_v29 = vpop.f32.mrf.mxu1 }
  0xe7   :  { %v135_v34 = vadd.f32 %v1882_v33, %v134_v29  ;;  %v896_v29 = vld [vmem:[#allocation6 + $0x20] sm:$0xff] }
  0xe8   :  { %v1192_v30 = vpop.f32.mrf.mxu1 }
  0xe9   :  { %v895_v30 = vld [vmem:[#allocation6 + $0x18] sm:$0xff] }
  0xf0   :  { %v244_v31 = vpop.f32.mrf.mxu1 }
  0xf1   :  { %v245_v51 = vadd.f32 %v1882_v33, %v244_v31  ;;  %v894_v31 = vld [vmem:[#allocation6 + $0x10] sm:$0xff] }
  0xf2   :  { %v1203_v32 = vpop.f32.mrf.mxu1 }
  0xf3   :  { %v893_v32 = vld [vmem:[#allocation6 + $0x8] sm:$0xff] }
  0xf8   :  { %v1885_v35 = vpop.f32.mrf.mxu1 }
  0xf9   :  { %v250_v56 = vadd.f32 %v1882_v33, %v1885_v35 }
  0xfa   :  { %v1206_v36 = vpop.f32.mrf.mxu1 }
  0xfe   :  { %v368_v37 = vpop.f32.mrf.mxu0  ;;  %v1887_v40 = vpop.f32.mrf.mxu1 }
  0xff   :  { %v372_v38 = vadd.f32 %v368_v37, %v135_v34  ;;  %v255_v61 = vadd.f32 %v1882_v33, %v1887_v40  ;;  %v892_v34 = vld [vmem:[#allocation6] sm:$0xff] }
 0x100   :  { %v1256_v39 = vpop.f32.mrf.mxu0  ;;  %v1209_v41 = vpop.f32.mrf.mxu1  ;;  %v1012_v40 = vld [vmem:[%s2107_s5] ss:$0 sm:$0xff] }
 0x101   :  { %1544 = vtanh.f32 %v372_v38 }
 0x10e   :  { %v1545_v42 = vpop.eup %1544 }
 0x10f   :  { %1290 = vmatmul.mubr.f32.vlgmr.msra.gmra.mxu1 %v1545_v42 }
 0x110   :  { %1328 = vmatpush3.msra.mxu1 %v1680_v1  ;;  %1359 = vmatprep.mubr.msk.f32.mxu1 %vm1631_vm0, %v1630_v0 }
 0x111   :  { %1329 = vmatprep.subr.mxu1 %v1630_v0 }
 0x112   :  { %1330 = vmatpush3.msra.mxu1 %v1682_v2 }
 0x113   :  { %1331 = vmatprep.subr.mxu1 %v1630_v0 }
 0x114   :  { %1332 = vmatpush3.msra.mxu1 %v1686_v3 }
 0x115   :  { %1333 = vmatprep.subr.mxu1 %v1630_v0 }
 0x116   :  { %1334 = vmatpush3.msra.mxu1 %v1693_v5 }
 0x117   :  { %1335 = vmatprep.subr.mxu1 %v1630_v0  ;;  %v1919_v43 = vpop.f32.mrf.mxu1 }
 0x118   :  { %1336 = vmatpush3.msra.mxu1 %v1704_v8  ;;  %v260_v7 = vadd.f32 %v1882_v33, %v1919_v43 }
 0x119   :  { %1337 = vmatprep.subr.mxu1 %v1630_v0  ;;  %v1212_v44 = vpop.f32.mrf.mxu1 }
 0x11a   :  { %1338 = vmatpush3.msra.mxu1 %v1712_v10 }
 0x11b   :  { %1339 = vmatprep.subr.mxu1 %v1630_v0  ;;  %v1925_v45 = vpop.f32.mrf.mxu1 }
 0x11c   :  { %1340 = vmatpush3.msra.mxu1 %v1720_v12 }
 0x11d   :  { %1341 = vmatprep.subr.mxu1 %v1630_v0  ;;  %v1215_v46 = vpop.f32.mrf.mxu1 }
 0x11e   :  { %1342 = vmatpush3.msra.mxu1 %v1725_v13 }
 0x11f   :  { %1343 = vmatprep.subr.mxu1 %v1630_v0  ;;  %v1927_v47 = vpop.f32.mrf.mxu1 }
 0x120   :  { %1344 = vmatpush3.msra.mxu1 %v1730_v14 }
 0x121   :  { %1345 = vmatprep.subr.mxu1 %v1630_v0  ;;  %v1218_v48 = vpop.f32.mrf.mxu1 }
 0x122   :  { %1346 = vmatpush3.msra.mxu1 %v1735_v15 }
 0x123   :  { %1347 = vmatprep.subr.mxu1 %v1630_v0  ;;  %v1929_v49 = vpop.f32.mrf.mxu1 }
 0x124   :  { %1348 = vmatpush3.msra.mxu1 %v1740_v16  ;;  %v275_v35 = vadd.f32 %v1882_v33, %v1929_v49 }
 0x125   :  { %1349 = vmatprep.subr.mxu1 %v1630_v0  ;;  %v1221_v50 = vpop.f32.mrf.mxu1 }
 0x126   :  { %1350 = vmatpush3.msra.mxu1 %v1748_v18 }
 0x127   :  { %1351 = vmatprep.subr.mxu1 %v1630_v0 }
 0x128   :  { %1352 = vmatpush3.msra.mxu1 %v1755_v19 }
 0x129   :  { %1353 = vmatprep.subr.mxu1 %v1630_v0 }
 0x12a   :  { %1354 = vmatpush3.msra.mxu1 %v1761_v20 }
 0x12b   :  { %1355 = vmatprep.subr.mxu1 %v1630_v0 }
 0x12c   :  { %1356 = vmatpush3.msra.mxu1 %v1767_v21 }
 0x12d   :  { %1357 = vmatprep.subr.mxu1 %v1630_v0 }
 0x12e   :  { %1358 = vmatpush3.msra.mxu1 %v1777_v23 }
 0x12f   :  { %1397 = vmatprep.subr.mxu1 %v1630_v0 }
 0x1cf   :  { %v442_v52 = vpop.f32.mrf.mxu1 }
 0x1d0   :  { %v446_v53 = vadd.f32 %v442_v52, %v245_v51 }
 0x1d1   :  { %v1291_v54 = vpop.f32.mrf.mxu1 }
 0x1d2   :  { %1546 = vtanh.f32 %v446_v53 }
 0x1df   :  { %v1547_v55 = vpop.eup %1546 }
 0x1e0   :  { %1325 = vmatmul.mubr.f32.vlgmr.msra.gmra.mxu0 %v1547_v55 }
 0x1e1   :  { %1363 = vmatpush3.msra.mxu0 %v1680_v1  ;;  %1394 = vmatprep.mubr.msk.f32.mxu0 %vm1631_vm0, %v1630_v0 }
 0x1e2   :  { %1364 = vmatprep.subr.mxu0 %v1630_v0 }
 0x1e3   :  { %1365 = vmatpush3.msra.mxu0 %v1682_v2 }
 0x1e4   :  { %1366 = vmatprep.subr.mxu0 %v1630_v0 }
 0x1e5   :  { %1367 = vmatpush3.msra.mxu0 %v1686_v3 }
 0x1e6   :  { %1368 = vmatprep.subr.mxu0 %v1630_v0 }
 0x1e7   :  { %1369 = vmatpush3.msra.mxu0 %v1693_v5 }
 0x1e8   :  { %1370 = vmatprep.subr.mxu0 %v1630_v0 }
 0x1e9   :  { %1371 = vmatpush3.msra.mxu0 %v1704_v8 }
 0x1ea   :  { %1372 = vmatprep.subr.mxu0 %v1630_v0 }
 0x1eb   :  { %1373 = vmatpush3.msra.mxu0 %v1712_v10 }
 0x1ec   :  { %1374 = vmatprep.subr.mxu0 %v1630_v0 }
 0x1ed   :  { %1375 = vmatpush3.msra.mxu0 %v1720_v12 }
 0x1ee   :  { %1376 = vmatprep.subr.mxu0 %v1630_v0 }
 0x1ef   :  { %1377 = vmatpush3.msra.mxu0 %v1725_v13 }
 0x1f0   :  { %1378 = vmatprep.subr.mxu0 %v1630_v0 }
 0x1f1   :  { %1379 = vmatpush3.msra.mxu0 %v1730_v14 }
 0x1f2   :  { %1380 = vmatprep.subr.mxu0 %v1630_v0 }
 0x1f3   :  { %1381 = vmatpush3.msra.mxu0 %v1735_v15 }
 0x1f4   :  { %1382 = vmatprep.subr.mxu0 %v1630_v0 }
 0x1f5   :  { %1383 = vmatpush3.msra.mxu0 %v1740_v16 }
 0x1f6   :  { %1384 = vmatprep.subr.mxu0 %v1630_v0 }
 0x1f7   :  { %1385 = vmatpush3.msra.mxu0 %v1748_v18 }
 0x1f8   :  { %1386 = vmatprep.subr.mxu0 %v1630_v0 }
 0x1f9   :  { %1387 = vmatpush3.msra.mxu0 %v1755_v19 }
 0x1fa   :  { %1388 = vmatprep.subr.mxu0 %v1630_v0 }
 0x1fb   :  { %1389 = vmatpush3.msra.mxu0 %v1761_v20 }
 0x1fc   :  { %1390 = vmatprep.subr.mxu0 %v1630_v0 }
 0x1fd   :  { %1391 = vmatpush3.msra.mxu0 %v1767_v21 }
 0x1fe   :  { %1392 = vmatprep.subr.mxu0 %v1630_v0 }
 0x1ff   :  { %1393 = vmatpush3.msra.mxu0 %v1777_v23 }
 0x200   :  { %1432 = vmatprep.subr.mxu0 %v1630_v0 }
 0x2a0   :  { %v516_v57 = vpop.f32.mrf.mxu0 }
 0x2a1   :  { %v520_v58 = vadd.f32 %v516_v57, %v250_v56 }
 0x2a2   :  { %v1326_v59 = vpop.f32.mrf.mxu0 }
 0x2a3   :  { %1548 = vtanh.f32 %v520_v58 }
 0x2b0   :  { %v1549_v60 = vpop.eup %1548 }
 0x2b1   :  { %1360 = vmatmul.mubr.f32.vlgmr.msra.gmra.mxu1 %v1549_v60 }
 0x2b2   :  { %1398 = vmatpush3.msra.mxu1 %v1680_v1  ;;  %1429 = vmatprep.mubr.msk.f32.mxu1 %vm1631_vm0, %v1630_v0 }
 0x2b3   :  { %1399 = vmatprep.subr.mxu1 %v1630_v0 }
 0x2b4   :  { %1400 = vmatpush3.msra.mxu1 %v1682_v2 }
 0x2b5   :  { %1401 = vmatprep.subr.mxu1 %v1630_v0 }
 0x2b6   :  { %1402 = vmatpush3.msra.mxu1 %v1686_v3 }
 0x2b7   :  { %1403 = vmatprep.subr.mxu1 %v1630_v0 }
 0x2b8   :  { %1404 = vmatpush3.msra.mxu1 %v1693_v5 }
 0x2b9   :  { %1405 = vmatprep.subr.mxu1 %v1630_v0 }
 0x2ba   :  { %1406 = vmatpush3.msra.mxu1 %v1704_v8 }
 0x2bb   :  { %1407 = vmatprep.subr.mxu1 %v1630_v0 }
 0x2bc   :  { %1408 = vmatpush3.msra.mxu1 %v1712_v10 }
 0x2bd   :  { %1409 = vmatprep.subr.mxu1 %v1630_v0 }
 0x2be   :  { %1410 = vmatpush3.msra.mxu1 %v1720_v12 }
 0x2bf   :  { %1411 = vmatprep.subr.mxu1 %v1630_v0 }
 0x2c0   :  { %1412 = vmatpush3.msra.mxu1 %v1725_v13 }
 0x2c1   :  { %1413 = vmatprep.subr.mxu1 %v1630_v0 }
 0x2c2   :  { %1414 = vmatpush3.msra.mxu1 %v1730_v14 }
 0x2c3   :  { %1415 = vmatprep.subr.mxu1 %v1630_v0 }
 0x2c4   :  { %1416 = vmatpush3.msra.mxu1 %v1735_v15 }
 0x2c5   :  { %1417 = vmatprep.subr.mxu1 %v1630_v0 }
 0x2c6   :  { %1418 = vmatpush3.msra.mxu1 %v1740_v16 }
 0x2c7   :  { %1419 = vmatprep.subr.mxu1 %v1630_v0 }
 0x2c8   :  { %1420 = vmatpush3.msra.mxu1 %v1748_v18 }
 0x2c9   :  { %1421 = vmatprep.subr.mxu1 %v1630_v0 }
 0x2ca   :  { %1422 = vmatpush3.msra.mxu1 %v1755_v19 }
 0x2cb   :  { %1423 = vmatprep.subr.mxu1 %v1630_v0 }
 0x2cc   :  { %1424 = vmatpush3.msra.mxu1 %v1761_v20 }
 0x2cd   :  { %1425 = vmatprep.subr.mxu1 %v1630_v0 }
 0x2ce   :  { %1426 = vmatpush3.msra.mxu1 %v1767_v21 }
 0x2cf   :  { %1427 = vmatprep.subr.mxu1 %v1630_v0 }
 0x2d0   :  { %1428 = vmatpush3.msra.mxu1 %v1777_v23 }
 0x2d1   :  { %1467 = vmatprep.subr.mxu1 %v1630_v0 }
 0x371   :  { %v590_v62 = vpop.f32.mrf.mxu1 }
 0x372   :  { %v594_v63 = vadd.f32 %v590_v62, %v255_v61 }
 0x373   :  { %v1361_v4 = vpop.f32.mrf.mxu1 }
 0x374   :  { %1550 = vtanh.f32 %v594_v63 }
 0x381   :  { %v1551_v6 = vpop.eup %1550 }
 0x382   :  { %1395 = vmatmul.mubr.f32.vlgmr.msra.gmra.mxu0 %v1551_v6 }
 0x383   :  { %1433 = vmatpush3.msra.mxu0 %v1680_v1  ;;  %1464 = vmatprep.mubr.msk.f32.mxu0 %vm1631_vm0, %v1630_v0 }
 0x384   :  { %1434 = vmatprep.subr.mxu0 %v1630_v0 }
 0x385   :  { %1435 = vmatpush3.msra.mxu0 %v1682_v2 }
 0x386   :  { %1436 = vmatprep.subr.mxu0 %v1630_v0 }
 0x387   :  { %1437 = vmatpush3.msra.mxu0 %v1686_v3 }
 0x388   :  { %1438 = vmatprep.subr.mxu0 %v1630_v0 }
 0x389   :  { %1439 = vmatpush3.msra.mxu0 %v1693_v5 }
 0x38a   :  { %1440 = vmatprep.subr.mxu0 %v1630_v0 }
 0x38b   :  { %1441 = vmatpush3.msra.mxu0 %v1704_v8 }
 0x38c   :  { %1442 = vmatprep.subr.mxu0 %v1630_v0 }
 0x38d   :  { %1443 = vmatpush3.msra.mxu0 %v1712_v10 }
 0x38e   :  { %1444 = vmatprep.subr.mxu0 %v1630_v0 }
 0x38f   :  { %1445 = vmatpush3.msra.mxu0 %v1720_v12 }
 0x390   :  { %1446 = vmatprep.subr.mxu0 %v1630_v0 }
 0x391   :  { %1447 = vmatpush3.msra.mxu0 %v1725_v13 }
 0x392   :  { %1448 = vmatprep.subr.mxu0 %v1630_v0 }
 0x393   :  { %1449 = vmatpush3.msra.mxu0 %v1730_v14 }
 0x394   :  { %1450 = vmatprep.subr.mxu0 %v1630_v0 }
 0x395   :  { %1451 = vmatpush3.msra.mxu0 %v1735_v15 }
 0x396   :  { %1452 = vmatprep.subr.mxu0 %v1630_v0 }
 0x397   :  { %1453 = vmatpush3.msra.mxu0 %v1740_v16 }
 0x398   :  { %1454 = vmatprep.subr.mxu0 %v1630_v0 }
 0x399   :  { %1455 = vmatpush3.msra.mxu0 %v1748_v18 }
 0x39a   :  { %1456 = vmatprep.subr.mxu0 %v1630_v0 }
 0x39b   :  { %1457 = vmatpush3.msra.mxu0 %v1755_v19 }
 0x39c   :  { %1458 = vmatprep.subr.mxu0 %v1630_v0 }
 0x39d   :  { %1459 = vmatpush3.msra.mxu0 %v1761_v20 }
 0x39e   :  { %1460 = vmatprep.subr.mxu0 %v1630_v0 }
 0x39f   :  { %1461 = vmatpush3.msra.mxu0 %v1767_v21 }
 0x3a0   :  { %1462 = vmatprep.subr.mxu0 %v1630_v0 }
 0x3a1   :  { %1463 = vmatpush3.msra.mxu0 %v1777_v23 }
 0x3a2   :  { %1502 = vmatprep.subr.mxu0 %v1630_v0 }
 0x442   :  { %v664_v9 = vpop.f32.mrf.mxu0 }
 0x443   :  { %v668_v11 = vadd.f32 %v664_v9, %v260_v7 }
 0x444   :  { %v1396_v17 = vpop.f32.mrf.mxu0 }
 0x445   :  { %1552 = vtanh.f32 %v668_v11 }
 0x452   :  { %v1553_v22 = vpop.eup %1552 }
 0x453   :  { %1430 = vmatmul.mubr.f32.vlgmr.msra.gmra.mxu1 %v1553_v22 }
 0x454   :  { %1468 = vmatpush3.msra.mxu1 %v1680_v1  ;;  %1499 = vmatprep.mubr.msk.f32.mxu1 %vm1631_vm0, %v1630_v0  ;;  %v265_v1 = vadd.f32 %v1882_v33, %v1925_v45 }
 0x455   :  { %1469 = vmatprep.subr.mxu1 %v1630_v0 }
 0x456   :  { %1470 = vmatpush3.msra.mxu1 %v1682_v2 }
 0x457   :  { %1471 = vmatprep.subr.mxu1 %v1630_v0 }
 0x458   :  { %1472 = vmatpush3.msra.mxu1 %v1686_v3 }
 0x459   :  { %1473 = vmatprep.subr.mxu1 %v1630_v0 }
 0x45a   :  { %1474 = vmatpush3.msra.mxu1 %v1693_v5 }
 0x45b   :  { %1475 = vmatprep.subr.mxu1 %v1630_v0 }
 0x45c   :  { %1476 = vmatpush3.msra.mxu1 %v1704_v8 }
 0x45d   :  { %1477 = vmatprep.subr.mxu1 %v1630_v0 }
 0x45e   :  { %1478 = vmatpush3.msra.mxu1 %v1712_v10  ;;  %v907_v10 = vld [vmem:[#allocation6 + $0x78] sm:$0xff] }
 0x45f   :  { %1479 = vmatprep.subr.mxu1 %v1630_v0 }
 0x460   :  { %1480 = vmatpush3.msra.mxu1 %v1720_v12  ;;  %v906_v12 = vld [vmem:[#allocation6 + $0x70] sm:$0xff] }
 0x461   :  { %1481 = vmatprep.subr.mxu1 %v1630_v0 }
 0x462   :  { %1482 = vmatpush3.msra.mxu1 %v1725_v13  ;;  %v905_v13 = vld [vmem:[#allocation6 + $0x68] sm:$0xff] }
 0x463   :  { %1483 = vmatprep.subr.mxu1 %v1630_v0 }
 0x464   :  { %1484 = vmatpush3.msra.mxu1 %v1730_v14  ;;  %v904_v14 = vld [vmem:[#allocation6 + $0x60] sm:$0xff] }
 0x465   :  { %1485 = vmatprep.subr.mxu1 %v1630_v0 }
 0x466   :  { %1486 = vmatpush3.msra.mxu1 %v1735_v15  ;;  %v903_v15 = vld [vmem:[#allocation6 + $0x58] sm:$0xff] }
 0x467   :  { %1487 = vmatprep.subr.mxu1 %v1630_v0 }
 0x468   :  { %1488 = vmatpush3.msra.mxu1 %v1740_v16  ;;  %v902_v16 = vld [vmem:[#allocation6 + $0x50] sm:$0xff] }
 0x469   :  { %1489 = vmatprep.subr.mxu1 %v1630_v0 }
 0x46a   :  { %1490 = vmatpush3.msra.mxu1 %v1748_v18  ;;  %v901_v18 = vld [vmem:[#allocation6 + $0x48] sm:$0xff] }
 0x46b   :  { %1491 = vmatprep.subr.mxu1 %v1630_v0 }
 0x46c   :  { %1492 = vmatpush3.msra.mxu1 %v1755_v19  ;;  %v270_v19 = vadd.f32 %v1882_v33, %v1927_v47 }
 0x46d   :  { %1493 = vmatprep.subr.mxu1 %v1630_v0 }
 0x46e   :  { %1494 = vmatpush3.msra.mxu1 %v1761_v20 }
 0x46f   :  { %1495 = vmatprep.subr.mxu1 %v1630_v0 }
 0x470   :  { %1496 = vmatpush3.msra.mxu1 %v1767_v21 }
 0x471   :  { %1497 = vmatprep.subr.mxu1 %v1630_v0 }
 0x472   :  { %1498 = vmatpush3.msra.mxu1 %v1777_v23 }
 0x513   :  { %v738_v2 = vpop.f32.mrf.mxu1 }
 0x514   :  { %v742_v3 = vadd.f32 %v738_v2, %v265_v1 }
 0x515   :  { %v1431_v5 = vpop.f32.mrf.mxu1 }
 0x516   :  { %1554 = vtanh.f32 %v742_v3 }
 0x523   :  { %v1555_v8 = vpop.eup %1554 }
 0x524   :  { %1465 = vmatmul.mubr.f32.vlgmr.msra.gmra.mxu0 %v1555_v8 }
 0x525   :  { %1534 = vmatprep.mubr.msk.f32.mxu0 %vm1631_vm0, %v1630_v0  ;;  %1503 = vmatpush3.msra.mxu0 %v907_v10 }
 0x526   :  { %1504 = vmatprep.subr.mxu0 %v1630_v0 }
 0x527   :  { %1505 = vmatpush3.msra.mxu0 %v906_v12 }
 0x528   :  { %1506 = vmatprep.subr.mxu0 %v1630_v0 }
 0x529   :  { %1507 = vmatpush3.msra.mxu0 %v905_v13 }
 0x52a   :  { %1508 = vmatprep.subr.mxu0 %v1630_v0 }
 0x52b   :  { %1509 = vmatpush3.msra.mxu0 %v904_v14 }
 0x52c   :  { %1510 = vmatprep.subr.mxu0 %v1630_v0 }
 0x52d   :  { %1511 = vmatpush3.msra.mxu0 %v903_v15 }
 0x52e   :  { %1512 = vmatprep.subr.mxu0 %v1630_v0 }
 0x52f   :  { %1513 = vmatpush3.msra.mxu0 %v902_v16 }
 0x530   :  { %1514 = vmatprep.subr.mxu0 %v1630_v0 }
 0x531   :  { %1515 = vmatpush3.msra.mxu0 %v901_v18 }
 0x532   :  { %1516 = vmatprep.subr.mxu0 %v1630_v0 }
 0x533   :  { %1517 = vmatpush3.msra.mxu0 %v900_v25 }
 0x534   :  { %1518 = vmatprep.subr.mxu0 %v1630_v0 }
 0x535   :  { %1519 = vmatpush3.msra.mxu0 %v899_v26 }
 0x536   :  { %1520 = vmatprep.subr.mxu0 %v1630_v0 }
 0x537   :  { %1521 = vmatpush3.msra.mxu0 %v898_v27 }
 0x538   :  { %1522 = vmatprep.subr.mxu0 %v1630_v0 }
 0x539   :  { %1523 = vmatpush3.msra.mxu0 %v897_v28 }
 0x53a   :  { %1524 = vmatprep.subr.mxu0 %v1630_v0 }
 0x53b   :  { %1525 = vmatpush3.msra.mxu0 %v896_v29 }
 0x53c   :  { %1526 = vmatprep.subr.mxu0 %v1630_v0 }
 0x53d   :  { %1527 = vmatpush3.msra.mxu0 %v895_v30 }
 0x53e   :  { %1528 = vmatprep.subr.mxu0 %v1630_v0 }
 0x53f   :  { %1529 = vmatpush3.msra.mxu0 %v894_v31 }
 0x540   :  { %1530 = vmatprep.subr.mxu0 %v1630_v0 }
 0x541   :  { %1531 = vmatpush3.msra.mxu0 %v893_v32 }
 0x542   :  { %1532 = vmatprep.subr.mxu0 %v1630_v0 }
 0x543   :  { %1533 = vmatpush3.msra.mxu0 %v892_v34 }
 0x5e4   :  { %v812_v20 = vpop.f32.mrf.mxu0 }
 0x5e5   :  { %v816_v21 = vadd.f32 %v812_v20, %v270_v19 }
 0x5e6   :  { %v1466_v23 = vpop.f32.mrf.mxu0 }
 0x5e7   :  { %1556 = vtanh.f32 %v816_v21 }
 0x5f4   :  { %v1557_v24 = vpop.eup %1556 }
 0x5f5   :  { %1500 = vmatmul.mubr.f32.vlgmr.msra.gmra.mxu1 %v1557_v24 }
 0x6b5   :  { %v886_v36 = vpop.f32.mrf.mxu1 }
 0x6b6   :  { %v890_v37 = vadd.f32 %v886_v36, %v275_v35 }
 0x6b7   :  { %v1501_v38 = vpop.f32.mrf.mxu1 }
 0x6b8   :  { %1558 = vtanh.f32 %v890_v37 }
 0x6c5   :  { %v1559_v39 = vpop.eup %1558 }
 0x6c6   :  { %1535 = vmatmul.mubr.f32.vlgmr.msra.gmra.mxu0 %v1559_v39 }
 0x786   :  { %v981_v41 = vpop.f32.mrf.mxu0 }
 0x787   :  { %v982_v42 = vadd.f32 %v1012_v40, %v981_v41 }
 0x788   :  { %v1536_v0 = vpop.f32.mrf.mxu0 }
 0x789   :  { %985 = vst [vmem:[#allocation8] sm:$0xff] %v982_v42 }
 0x78a   :  { %1611 = shalt.err (!%p1608_p0)
}
 0x78b   :  { %995 = dma.vmem_to_hbm [thread:$0]  %s993_s2, 128, %s2108_s6, [#allocation5]  }
 0x78c   :  { %1624 = dma.done.wait [#allocation5], 128  }
 0x78d   :  { %1625 = vsyncadd [#allocation5], 4294967168 }
 0x78e   :  { %999 = vsyncpa [#allocation4], 1 }
 0x78f   :  { %1000 = vsyncpa [#allocation7], 1 }
 0x790   :  { %1001 = vsyncpa [#allocation5], 1 }

</bundles_post_ra>
